<compile_context>
chip_gen: v7x
topology: tpu7x:2x2x1
jax: 0.10.0
libtpu: 0.0.40
codegen_flags: <defaults>
</compile_context>

<pallas_src>
import functools

import jax
import jax.numpy as jnp
from jax.experimental import pallas as pl
from jax.experimental.pallas import tpu as pltpu


def feedforward_kernel(x_ref, w_ref, o_ref, *, c):
    """out = relu(x + x @ W_eff - c) on one [tm, dim] row tile."""
    x = x_ref[...]                                   # keep native dtype (bf16 stays bf16)
    xw = jnp.dot(x, w_ref[...], preferred_element_type=jnp.float32)  # f32 accumulate
    out = jnp.maximum(x.astype(jnp.float32) + xw - c, 0.0)
    o_ref[...] = out.astype(o_ref.dtype)


def feedforward(x, weight, *, step_size=0.1, lambd=0.1, tm=256):
    """x: [..., dim]; weight: [dim, dim] (PyTorch F.linear convention)."""
    orig_shape = x.shape
    dim = orig_shape[-1]
    x2d = x.reshape(-1, dim)
    M = x2d.shape[0]

    # ---- one-off weight fold (f32 accumulate, cast back to compute dtype) ----
    w32 = weight.astype(jnp.float32)
    w_eff = step_size * (w32 - jnp.dot(w32.T, w32, preferred_element_type=jnp.float32))
    w_eff = w_eff.astype(x.dtype)
    c = float(step_size) * float(lambd)              # hoisted scalar constant

    # ---- row tiling: large MXU-friendly tile; pad M so any row count works ----
    tm_eff = max(8, min(int(tm), pl.cdiv(M, 8) * 8))
    tm_eff = ((tm_eff + 7) // 8) * 8
    m_pad = pl.cdiv(M, tm_eff) * tm_eff
    if m_pad != M:
        x2d = jnp.pad(x2d, ((0, m_pad - M), (0, 0)))

    # ---- VMEM budget: 2x double-buffered x tiles + 2x out tiles + weight ----
    xb = jnp.dtype(x2d.dtype).itemsize
    wb = jnp.dtype(w_eff.dtype).itemsize
    need = 4 * tm_eff * dim * xb + 2 * dim * dim * wb
    vmem_limit = int(min(max(32 << 20, int(need * 1.25) + (2 << 20)), 96 << 20))

    kernel = functools.partial(feedforward_kernel, c=c)

    out2d = pl.pallas_call(
        kernel,
        out_shape=jax.ShapeDtypeStruct((m_pad, dim), x.dtype),
        grid_spec=pltpu.PrefetchScalarGridSpec(
            num_scalar_prefetch=0,
            grid=(m_pad // tm_eff,),
            in_specs=[
                pl.BlockSpec((tm_eff, dim), lambda i: (i, 0)),   # x row tile
                # W_eff: constant block index -> DMA'd once, resident across the grid.
                pl.BlockSpec((dim, dim), lambda i: (0, 0)),
            ],
            out_specs=pl.BlockSpec((tm_eff, dim), lambda i: (i, 0)),
        ),
        compiler_params=pltpu.CompilerParams(
            dimension_semantics=("parallel",),       # row axis shards across TCs (megacore)
            vmem_limit_bytes=vmem_limit,
        ),
    )(x2d, w_eff)

    if m_pad != M:
        out2d = out2d[:M]
    return out2d.reshape(orig_shape)


def reference(x, weight, step_size=0.1, lambd=0.1):
    x1 = x @ weight.T
    grad_1 = x1 @ weight
    grad_2 = x @ weight
    grad_update = step_size * (grad_2 - grad_1) - step_size * lambd
    return jnp.maximum(x + grad_update, 0.0)


if __name__ == "__main__":
    key = jax.random.PRNGKey(0)
    batch, seq, dim = 2, 8, 32

    kx, kw = jax.random.split(key)
    x = jax.random.normal(kx, (batch, seq, dim), dtype=jnp.float32)

    # Deterministic Kaiming-uniform-like init: bound = sqrt(6 / fan_in)
    bound = (6.0 / dim) ** 0.5
    weight = jax.random.uniform(kw, (dim, dim), dtype=jnp.float32,
                                minval=-bound, maxval=bound)

    out = feedforward(x, weight, step_size=0.1, lambd=0.1)
    out = jax.block_until_ready(out)

    ref = reference(x, weight)
    assert out.shape == x.shape
    assert jnp.allclose(out, ref, atol=1e-4, rtol=1e-4), "mismatch vs reference"
    print("KERNEL_OK")
</pallas_src>

<mosaic_0001>
module attributes {stable_mosaic.version = 11 : i64} {
  func.func @feedforward_kernel(%arg0: i32, %arg1: memref<16x32xf32, #tpu.memory_space<vmem>>, %arg2: memref<32x32xf32, #tpu.memory_space<vmem>>, %arg3: memref<16x32xf32, #tpu.memory_space<vmem>>) attributes {dimension_semantics = [#tpu.dimension_semantics<parallel>], iteration_bounds = array<i64: 1>, scalar_prefetch = 0 : i64, scratch_operands = 0 : i64, tpu.core_type = #tpu.core_type<tc>, window_params = [{transform_indices = @transform_0, window_bounds = array<i64: 16, 32>}, {pipeline_mode = #tpu.pipeline_mode<synchronous>, transform_indices = @transform_1, window_bounds = array<i64: 32, 32>}, {transform_indices = @transform_2, window_bounds = array<i64: 16, 32>}]} {
    %c0 = arith.constant 0 : index
    %c0_0 = arith.constant 0 : index
    %0 = vector.load %arg1[%c0, %c0_0] : memref<16x32xf32, #tpu.memory_space<vmem>>, vector<16x32xf32>
    %c0_1 = arith.constant 0 : index
    %c0_2 = arith.constant 0 : index
    %1 = vector.load %arg2[%c0_1, %c0_2] : memref<32x32xf32, #tpu.memory_space<vmem>>, vector<32x32xf32>
    %cst = arith.constant dense<0.000000e+00> : vector<16x32xf32>
    %2 = tpu.matmul %0, %1, %cst {dimension_numbers = #tpu.dot_dimension_numbers<[1], [0], [0], [1], [0, 0, 1, 1], [], []>} : vector<16x32xf32>, vector<32x32xf32>, vector<16x32xf32> -> vector<16x32xf32>
    %3 = arith.addf %0, %2 : vector<16x32xf32>
    %cst_3 = arith.constant 0.00999999977 : f32
    %4 = vector.broadcast %cst_3 : f32 to vector<16x32xf32>
    %5 = arith.subf %3, %4 : vector<16x32xf32>
    %cst_4 = arith.constant 0.000000e+00 : f32
    %6 = vector.broadcast %cst_4 : f32 to vector<16x32xf32>
    %7 = arith.maximumf %5, %6 : vector<16x32xf32>
    %c0_5 = arith.constant 0 : index
    %c0_6 = arith.constant 0 : index
    %8 = vector.load %arg3[%c0_5, %c0_6] : memref<16x32xf32, #tpu.memory_space<vmem>>, vector<16x32xf32>
    tpu.vector_store %arg3[%c0_5, %c0_6], %7 {strides = array<i32>} : memref<16x32xf32, #tpu.memory_space<vmem>>, vector<16x32xf32>,
    return
  }
  func.func @transform_0(%arg0: i32) -> (i32, i32) {
    %c0_i32 = arith.constant 0 : i32
    %c0_i32_0 = arith.constant 0 : i32
    return %arg0, %c0_i32 : i32, i32
  }
  func.func @transform_1(%arg0: i32) -> (i32, i32) {
    %c0_i32 = arith.constant 0 : i32
    %c0_i32_0 = arith.constant 0 : i32
    %c0_i32_1 = arith.constant 0 : i32
    return %c0_i32, %c0_i32_0 : i32, i32
  }
  func.func @transform_2(%arg0: i32) -> (i32, i32) {
    %c0_i32 = arith.constant 0 : i32
    %c0_i32_0 = arith.constant 0 : i32
    return %arg0, %c0_i32 : i32, i32
  }
}

</mosaic_0001>

<bundles_post_ra>
// kernel: tpu_custom_call.1
= control target key start
LH: loop header
LB: loop body
LE: loop exit
PB: predicated region body
PF: predicated region fallthrough
CT: control target
= control target key end

     0   :  { %7 = vsyncpa [#allocation3], 0  ;;  %s329_s0 = inlined_call_operand.hbm [shape: f32[16,32], index: 0, kind: input, shape index: {}]   ;;  %s330_s1 = inlined_call_operand.hbm [shape: f32[32,32], index: 1, kind: input, shape index: {}]   ;;  %s331_s2 = inlined_call_operand.hbm [shape: f32[16,32], index: 2, kind: output, shape index: {}]  }
   0x1   :  { %8 = vsyncpa [#allocation6], 0 }
   0x2   :  { %9 = vsyncpa [#allocation4], 0  ;;  %s260_s9 = smov [#allocation2]   ;;  %s188_s13 = scalar_lea.hbm %s329_s0, 256 }
   0x3   :  { %s15_s10 = sshll.u32 %s260_s9, 4  ;;  %p189_p0 = scmp.ne.s32.totalorder %s329_s0, %s188_s13  ;;  %s16_s10 = int_to_ptr.vmem [resolvable:$true] %s15_s10 }
   0x4   :  { %p192_p1 = scmp.lt.u32.totalorder %s188_s13, %s329_s0 }
   0x6   :  { %p194_p2 = pnand %p192_p1, %p189_p0 }
   0x8   :  { %197 = shalt.err (!%p194_p2)
}
   0x9   :  { %s198_s18 = scalar_lea.vmem %s16_s10, 256  ;;  %p203_p4 = scmp.lt.s32.totalorder %s16_s10, %s16_s10 }
   0xa   :  { %p199_p3 = scmp.ne.s32.totalorder %s16_s10, %s198_s18  ;;  %p204_p5 = scmp.lt.s32.totalorder %s198_s18, %s198_s18 }
   0xc   :  { %p205_p6 = por %p204_p5, %p203_p4 }
   0xe   :  { %p206_p7 = pnand %p205_p6, %p199_p3 }
  0x10   :  { %209 = shalt.err (!%p206_p7)
}
  0x11   :  { %s261_s19 = smov 128   ;;  %s262_s20 = smov 8  }
  0x12   :  { %21 = dma.hbm_to_vmem [thread:$0]  %s329_s0, 256, %s16_s10, [#allocation3], %s261_s19, %s261_s19, %s262_s20  }
  0x13   :  { %s263_s23 = smov [#allocation5]   ;;  %s210_s27 = scalar_lea.hbm %s330_s1, 512 }
  0x14   :  { %s27_s24 = sshll.u32 %s263_s23, 4  ;;  %p211_p8 = scmp.ne.s32.totalorder %s330_s1, %s210_s27  ;;  %s28_s24 = int_to_ptr.vmem [resolvable:$true] %s27_s24 }
  0x15   :  { %p214_p9 = scmp.lt.u32.totalorder %s210_s27, %s330_s1 }
  0x17   :  { %p216_p10 = pnand %p214_p9, %p211_p8 }
  0x19   :  { %219 = shalt.err (!%p216_p10)
}
  0x1a   :  { %s220_s4 = scalar_lea.vmem %s28_s24, 512  ;;  %p225_p12 = scmp.lt.s32.totalorder %s28_s24, %s28_s24 }
  0x1b   :  { %p221_p11 = scmp.ne.s32.totalorder %s28_s24, %s220_s4  ;;  %p226_p13 = scmp.lt.s32.totalorder %s220_s4, %s220_s4 }
  0x1d   :  { %p227_p0 = por %p226_p13, %p225_p12 }
  0x1f   :  { %p228_p1 = pnand %p227_p0, %p221_p11 }
  0x21   :  { %231 = shalt.err (!%p228_p1)
}
  0x22   :  { %33 = dma.hbm_to_vmem [thread:$0]  %s330_s1, 512, %s28_s24, [#allocation6], %s261_s19, %s261_s19, %s262_s20  }
  0x23   :  { %254 = dma.done.wait [#allocation3], 256  }
  0x24   :  { %255 = vsyncadd [#allocation3], 4294967040 }
  0x25   :  { %256 = dma.done.wait [#allocation6], 512  }
  0x26   :  { %257 = vsyncadd [#allocation6], 4294966784  ;;  %vm46_vm0 = vcmask 261120   ;;  %v42_v0 = vld [vmem:[#allocation5] sm:$0xff]  ;;  %v43_v1 = vld [vmem:[#allocation5 + $0x8] sm:$0xff]  ;;  %s264_s1 = smov [#allocation7]  }
  0x27   :  { %v44_v2 = vld [vmem:[#allocation5 + $0x10] sm:$0xff]  ;;  %v175_v3 = vpack.c.bf16 %v43_v1, %v42_v0  ;;  %v45_v4 = vld [vmem:[#allocation5 + $0x18] sm:$0xff]  ;;  %s141_s6 = sshll.u32 %s264_s1, 4  ;;  %s142_s6 = int_to_ptr.vmem [resolvable:$true] %s141_s6 }
  0x28   :  { %v40_v5 = vld [vmem:[#allocation2] sm:$0xff]  ;;  %v179_v6 = vpack.c.bf16 %v45_v4, %v44_v2  ;;  %v41_v7 = vld [vmem:[#allocation2 + $0x8] sm:$0xff]  ;;  %s232_s7 = scalar_lea.vmem %s142_s6, 256  ;;  %p237_p3 = scmp.lt.s32.totalorder %s142_s6, %s142_s6 }
  0x29   :  { %172 = vmatprep.mubr.msk.f32.mxu0 %vm46_vm0, %v40_v5  ;;  %176 = vmatprep.subr.bf16.mxu0 %v175_v3  ;;  %p233_p2 = scmp.ne.s32.totalorder %s142_s6, %s232_s7  ;;  %p238_p4 = scmp.lt.s32.totalorder %s232_s7, %s232_s7 }
  0x2a   :  { %178 = vmatpush3.bf16.msra.mxu0 %v175_v3 }
  0x2b   :  { %180 = vmatprep.subr.bf16.mxu0 %v179_v6  ;;  %p239_p5 = por %p238_p4, %p237_p3 }
  0x2d   :  { %p240_p6 = pnand %p239_p5, %p233_p2 }
  0x2e   :  { %182 = vmatpush3.bf16.msra.mxu0 %v179_v6 }
  0x31   :  { %173 = vmatmul.mubr.msk.f32.vlgmr.msra.gmra.mrb[0].mxu0 %vm46_vm0, %v41_v7 }
 0x104   :  { %v174_v8 = vpop.f32.mrb[0].mxu0 }
 0x105   :  { %v129_v9 = vadd.f32 %v174_v8, %v41_v7  ;;  %v119_v10 = vpop.f32.mrb[1].mxu0 }
 0x106   :  { %v128_v11 = vadd.f32 %v119_v10, %v40_v5 }
 0x107   :  { %v157_v12 = vadd.f32 -0.01, %v129_v9 }
 0x108   :  { %v156_v13 = vadd.f32 -0.01, %v128_v11 }
 0x109   :  { %v133_v14 = vmax.f32 %v157_v12, 0.0 }
 0x10a   :  { %v132_v15 = vmax.f32 %v156_v13, 0.0 }
 0x10b   :  { %135 = vst.msk [vmem:[#allocation7 + $0x8] sm:$0xff] %vm46_vm0, %v133_v14 }
 0x10c   :  { %134 = vst.msk [vmem:[#allocation7] sm:$0xff] %vm46_vm0, %v132_v15 }
 0x10d   :  { %243 = shalt.err (!%p240_p6)
}
 0x10e   :  { %s244_s10 = scalar_lea.hbm %s331_s2, 256 }
 0x10f   :  { %p245_p7 = scmp.ne.s32.totalorder %s331_s2, %s244_s10  ;;  %p248_p8 = scmp.lt.u32.totalorder %s244_s10, %s331_s2 }
 0x111   :  { %p250_p9 = pnand %p248_p8, %p245_p7 }
 0x113   :  { %253 = shalt.err (!%p250_p9)
}
 0x114   :  { %147 = dma.vmem_to_hbm [thread:$0]  %s142_s6, 256, %s331_s2, [#allocation4], %s261_s19, %s261_s19, %s262_s20  }
 0x115   :  { %258 = dma.done.wait [#allocation4], 256  }
 0x116   :  { %259 = vsyncadd [#allocation4], 4294967040 }
 0x117   :  { %151 = vsyncpa [#allocation3], 1 }
 0x118   :  { %152 = vsyncpa [#allocation6], 1 }
 0x119   :  { %153 = vsyncpa [#allocation4], 1 }

</bundles_post_ra>
